<compile_context>
chip_gen: v5e
topology: v5e:2x2
jax: 0.10.0
libtpu: 0.0.40
codegen_flags: <defaults>
</compile_context>

<pallas_src>
import jax
import jax.numpy as jnp
from jax.experimental import pallas as pl
from jax.experimental.pallas import tpu as pltpu


def _round_up(v, m):
    return ((v + m - 1) // m) * m


# ---------------------------------------------------------------------------
# Kernel 1: Gram matrix  G = x @ x.T   (mirrors initGram).
# Grid (i, j, k): output tiles over (i, j), contraction over k (d axis) with an
# f32 VMEM accumulator so VMEM use is bounded for arbitrarily large d.
# ---------------------------------------------------------------------------
def gram_kernel(xa_ref, xb_ref, g_ref, acc_ref):
    @pl.when(pl.program_id(2) == 0)
    def _():
        acc_ref[...] = jnp.zeros_like(acc_ref)

    # (tm, tk) . (tm, tk)^T -> (tm, tm) on the MXU, f32 accumulate.
    acc_ref[...] += jax.lax.dot_general(
        xa_ref[...], xb_ref[...], (((1,), (1,)), ((), ())),
        preferred_element_type=jnp.float32,
    )

    @pl.when(pl.program_id(2) == pl.num_programs(2) - 1)
    def _():
        g_ref[...] = acc_ref[...]


def compute_gram(x, *, max_tile=512, max_tk=512):
    """Tiled G = x @ x.T.  512x512 tiles (~11 MiB with double buffering) fit
    the scoped-VMEM defaults of v5e (16 MiB), v6e (32 MiB) and v7x (32 MiB)."""
    x = x.astype(jnp.float32)
    n, d = x.shape

    # Row tiling (output tiles are tm x tm).
    if n <= max_tile:
        tm, n_pad = n, n                       # full-extent blocks (valid layout)
    else:
        tm = max_tile
        n_pad = _round_up(n, tm)
        x = jnp.pad(x, ((0, n_pad - n), (0, 0)))

    # Contraction (d) tiling -> bounded input blocks regardless of d.
    if d <= max_tk:
        tk, d_pad = d, d
    else:
        tk = max_tk
        d_pad = _round_up(d, tk)
        x = jnp.pad(x, ((0, 0), (0, d_pad - d)))

    gram = pl.pallas_call(
        gram_kernel,
        out_shape=jax.ShapeDtypeStruct((n_pad, n_pad), jnp.float32),
        grid_spec=pltpu.PrefetchScalarGridSpec(
            num_scalar_prefetch=0,
            grid=(n_pad // tm, n_pad // tm, d_pad // tk),
            in_specs=[
                pl.BlockSpec((tm, tk), lambda i, j, k: (i, k)),   # rows block
                pl.BlockSpec((tm, tk), lambda i, j, k: (j, k)),   # cols block
            ],
            out_specs=pl.BlockSpec((tm, tm), lambda i, j, k: (i, j)),
            scratch_shapes=[pltpu.VMEM((tm, tm), jnp.float32)],
        ),
        compiler_params=pltpu.CompilerParams(
            dimension_semantics=("parallel", "parallel", "arbitrary")),
    )(x, x)

    if n_pad != n:
        gram = gram[:n, :n]
    return gram


# ---------------------------------------------------------------------------
# Kernel 2 (setup-time): scores_raw = w @ Gram  with  w = alpha * y  (1, n).
# Grid (j, k): j over output-column tiles ("parallel"), k over the contraction
# ("arbitrary") with an f32 accumulator.  Bias is added on the host once.
# ---------------------------------------------------------------------------
def scores_kernel(w_ref, g_ref, o_ref, acc_ref):
    @pl.when(pl.program_id(1) == 0)
    def _():
        acc_ref[...] = jnp.zeros_like(acc_ref)

    acc_ref[...] += jax.lax.dot_general(
        w_ref[...], g_ref[...], (((1,), (0,)), ((), ())),
        preferred_element_type=jnp.float32,
    )

    @pl.when(pl.program_id(1) == pl.num_programs(1) - 1)
    def _():
        o_ref[...] = acc_ref[...]


def compute_scores(w_row, gram, *, max_tile=512):
    n = gram.shape[0]
    if n <= max_tile:
        t, n_pad = n, n
        g, w = gram, w_row
    else:
        t = max_tile
        n_pad = _round_up(n, t)
        g = jnp.pad(gram, ((0, n_pad - n), (0, n_pad - n)))
        w = jnp.pad(w_row, ((0, 0), (0, n_pad - n)))

    scores = pl.pallas_call(
        scores_kernel,
        out_shape=jax.ShapeDtypeStruct((1, n_pad), jnp.float32),
        grid_spec=pltpu.PrefetchScalarGridSpec(
            num_scalar_prefetch=0,
            grid=(n_pad // t, n_pad // t),          # (j: out cols, k: contraction)
            in_specs=[
                pl.BlockSpec((1, t), lambda j, k: (0, k)),
                pl.BlockSpec((t, t), lambda j, k: (k, j)),
            ],
            out_specs=pl.BlockSpec((1, t), lambda j, k: (0, j)),
            scratch_shapes=[pltpu.VMEM((1, t), jnp.float32)],
        ),
        compiler_params=pltpu.CompilerParams(
            dimension_semantics=("parallel", "arbitrary")),
    )(w, g)
    return scores[0, :n]


# ---------------------------------------------------------------------------
# Kernel 3 (optional dual-form path): batched Gram-row gather + MXU reduce.
#   out[b] = w . Gram[idx[b]]          (bias added on the host)
# One grid step per index; scalar-prefetched idx drives the row gather through
# the index_map; rows staged in a (round_up(B,8), n) VMEM scratch; final step
# does one (1,n)x(n,Br) MXU matmul.  No full zero-init; pad lanes are garbage
# and are sliced off by the wrapper.
# ---------------------------------------------------------------------------
def dual_forward_kernel(idx_ref, gram_row_ref, w_ref, out_ref, rows_buf):
    del idx_ref  # only consumed by the index_map
    i = pl.program_id(0)

    # Stage the gathered Gram row at sublane i of the (Br, n) scratch.
    rows_buf[pl.ds(i, 1), :] = gram_row_ref[0]          # (1, n)

    @pl.when(i == pl.num_programs(0) - 1)
    def _():
        # (1, n) x (Br, n)^T -> (1, Br) on the MXU.
        out_ref[...] = jax.lax.dot_general(
            w_ref[...], rows_buf[...], (((1,), (1,)), ((), ())),
            preferred_element_type=jnp.float32,
        )


class PerceptronLiHangBookDualFormPallas:
    """Pallas port of the PyTorch module (persistent Gram / score state)."""

    def __init__(self, x, y, alpha):
        x = jnp.asarray(x, jnp.float32)
        y = jnp.asarray(y, jnp.float32)
        alpha = jnp.asarray(alpha, jnp.float32)
        self.x, self.y, self.alpha = x, y, alpha
        self.n, self.d = x.shape

        # initGram equivalent (tiled MXU kernel, K-axis accumulation).
        self.gram = compute_gram(x)                                    # (n, n)

        # Hoisted out of the per-call forward path:
        self.w_row = (alpha * y).reshape(1, self.n).astype(jnp.float32)
        self.bias = jnp.dot(alpha, y)                                  # alpha . y
        # scores[i] = (alpha*y) . Gram[i] + alpha . y  (full forward, all idx)
        self.scores = compute_scores(self.w_row, self.gram) + self.bias
        # Row-gather layout for the optional dual-form kernel path.
        self.gram3 = self.gram.reshape(self.n, 1, self.n)

    # -- fast path: forward is a trivial gather of the precomputed scores ----
    def forward(self, idx):
        return self.scores[jnp.asarray(idx, jnp.int32)]

    def forward_batched(self, idxs):
        return self.scores[jnp.asarray(idxs, jnp.int32)]

    def __call__(self, idx):
        return self.forward(idx)

    # -- dual-form Pallas gather kernel (kept for the explicit Gram-row path) -
    def forward_batched_dual(self, idxs):
        idxs = jnp.asarray(idxs, jnp.int32)
        n = self.n
        B = int(idxs.shape[0])
        Br = max(_round_up(B, 8), 8)   # sublane-aligned scratch, not 128-wide

        out = pl.pallas_call(
            dual_forward_kernel,
            out_shape=jax.ShapeDtypeStruct((1, Br), jnp.float32),
            grid_spec=pltpu.PrefetchScalarGridSpec(
                num_scalar_prefetch=1,
                grid=(B,),
                in_specs=[
                    # data-dependent row gather: block index along axis 0 is idx[i]
                    pl.BlockSpec((1, 1, n), lambda i, idx_r: (idx_r[i], 0, 0)),
                    pl.BlockSpec((1, n), lambda i, idx_r: (0, 0)),   # w (resident)
                ],
                out_specs=pl.BlockSpec((1, Br), lambda i, idx_r: (0, 0)),
                scratch_shapes=[pltpu.VMEM((Br, n), jnp.float32)],
            ),
            compiler_params=pltpu.CompilerParams(
                # output + scratch are resident across the grid axis -> arbitrary
                dimension_semantics=("arbitrary",)),
        )(idxs, self.gram3, self.w_row)
        return out[0, :B] + self.bias

    # getWB has no per-call kernel value (setup-time, tiny); plain JAX.
    def getWB(self):
        w = (self.alpha * self.y) @ self.x
        b = jnp.dot(self.alpha, self.y)
        return w, b


if __name__ == "__main__":
    # Deterministic small problem: n samples of dim d, labels in {-1,+1}, alpha >= 0.
    n, d = 8, 32
    key = jax.random.PRNGKey(0)
    kx, ky, ka = jax.random.split(key, 3)
    x = jax.random.normal(kx, (n, d), dtype=jnp.float32)
    y = jnp.where(jax.random.bernoulli(ky, 0.5, (n,)), 1.0, -1.0).astype(jnp.float32)
    alpha = jax.random.uniform(ka, (n,), dtype=jnp.float32)

    model = PerceptronLiHangBookDualFormPallas(x, y, alpha)

    gram_ref = x @ x.T

    # Gram kernel check
    assert jnp.allclose(jax.block_until_ready(model.gram), gram_ref,
                        rtol=1e-5, atol=1e-5)

    # single-idx forward (original module semantics)
    idx = 3
    out1 = jax.block_until_ready(model.forward(idx))
    ref1 = jnp.dot(alpha, y * gram_ref[idx] + y)
    assert jnp.allclose(out1, ref1, rtol=1e-5, atol=1e-5), (out1, ref1)

    # batched forward over several indices (precomputed-score fast path)
    idx_list = [0, 3, 5, 7, 2, 1]
    idxs = jnp.array(idx_list, dtype=jnp.int32)
    outB = jax.block_until_ready(model.forward_batched(idxs))
    refB = jnp.stack([jnp.dot(alpha, y * gram_ref[i] + y) for i in idx_list])
    assert jnp.allclose(outB, refB, rtol=1e-5, atol=1e-5), (outB, refB)

    # batched forward via the explicit dual-form Pallas gather kernel
    outD = jax.block_until_ready(model.forward_batched_dual(idxs))
    assert jnp.allclose(outD, refB, rtol=1e-5, atol=1e-5), (outD, refB)

    print("KERNEL_OK")
</pallas_src>

<mosaic_0001>
module attributes {stable_mosaic.version = 11 : i64} {
  func.func @gram_kernel(%arg0: i32, %arg1: i32, %arg2: i32, %arg3: memref<8x32xf32, #tpu.memory_space<vmem>>, %arg4: memref<8x32xf32, #tpu.memory_space<vmem>>, %arg5: memref<8x8xf32, #tpu.memory_space<vmem>>, %arg6: memref<8x8xf32, #tpu.memory_space<vmem>>) attributes {dimension_semantics = [#tpu.dimension_semantics<parallel>, #tpu.dimension_semantics<parallel>, #tpu.dimension_semantics<arbitrary>], iteration_bounds = array<i64: 1, 1, 1>, scalar_prefetch = 0 : i64, scratch_operands = 1 : i64, tpu.core_type = #tpu.core_type<tc>, window_params = [{transform_indices = @transform_0, window_bounds = array<i64: 8, 32>}, {transform_indices = @transform_1, window_bounds = array<i64: 8, 32>}, {transform_indices = @transform_2, window_bounds = array<i64: 8, 8>}]} {
    %c0_i32 = arith.constant 0 : i32
    %0 = arith.cmpi eq, %arg2, %c0_i32 : i32
    %1 = arith.extui %0 : i1 to i32
    %c0_i32_0 = arith.constant 0 : i32
    %2 = arith.cmpi ne, %1, %c0_i32_0 : i32
    scf.if %2 {
      %cst_10 = arith.constant 0.000000e+00 : f32
      %12 = vector.broadcast %cst_10 : f32 to vector<8x8xf32>
      %c0_11 = arith.constant 0 : index
      %c0_12 = arith.constant 0 : index
      %13 = vector.load %arg6[%c0_11, %c0_12] : memref<8x8xf32, #tpu.memory_space<vmem>>, vector<8x8xf32>
      tpu.vector_store %arg6[%c0_11, %c0_12], %12 {strides = array<i32>} : memref<8x8xf32, #tpu.memory_space<vmem>>, vector<8x8xf32>,
    } else {
    }
    %c0 = arith.constant 0 : index
    %c0_1 = arith.constant 0 : index
    %3 = vector.load %arg6[%c0, %c0_1] : memref<8x8xf32, #tpu.memory_space<vmem>>, vector<8x8xf32>
    %c0_2 = arith.constant 0 : index
    %c0_3 = arith.constant 0 : index
    %4 = vector.load %arg3[%c0_2, %c0_3] : memref<8x32xf32, #tpu.memory_space<vmem>>, vector<8x32xf32>
    %c0_4 = arith.constant 0 : index
    %c0_5 = arith.constant 0 : index
    %5 = vector.load %arg4[%c0_4, %c0_5] : memref<8x32xf32, #tpu.memory_space<vmem>>, vector<8x32xf32>
    %cst = arith.constant dense<0.000000e+00> : vector<8x8xf32>
    %6 = tpu.matmul %4, %5, %cst {dimension_numbers = #tpu.dot_dimension_numbers<[1], [1], [0], [0], [0, 0, 1, 0], [], []>} : vector<8x32xf32>, vector<8x32xf32>, vector<8x8xf32> -> vector<8x8xf32>
    %7 = arith.addf %3, %6 : vector<8x8xf32>
    %c0_6 = arith.constant 0 : index
    %c0_7 = arith.constant 0 : index
    %8 = vector.load %arg6[%c0_6, %c0_7] : memref<8x8xf32, #tpu.memory_space<vmem>>, vector<8x8xf32>
    tpu.vector_store %arg6[%c0_6, %c0_7], %7 {strides = array<i32>} : memref<8x8xf32, #tpu.memory_space<vmem>>, vector<8x8xf32>,
    %c0_i32_8 = arith.constant 0 : i32
    %9 = arith.cmpi eq, %arg2, %c0_i32_8 : i32
    %10 = arith.extui %9 : i1 to i32
    %c0_i32_9 = arith.constant 0 : i32
    %11 = arith.cmpi ne, %10, %c0_i32_9 : i32
    scf.if %11 {
      %c0_10 = arith.constant 0 : index
      %c0_11 = arith.constant 0 : index
      %12 = vector.load %arg6[%c0_10, %c0_11] : memref<8x8xf32, #tpu.memory_space<vmem>>, vector<8x8xf32>
      %c0_12 = arith.constant 0 : index
      %c0_13 = arith.constant 0 : index
      %13 = vector.load %arg5[%c0_12, %c0_13] : memref<8x8xf32, #tpu.memory_space<vmem>>, vector<8x8xf32>
      tpu.vector_store %arg5[%c0_12, %c0_13], %12 {strides = array<i32>} : memref<8x8xf32, #tpu.memory_space<vmem>>, vector<8x8xf32>,
    } else {
    }
    return
  }
  func.func @transform_0(%arg0: i32, %arg1: i32, %arg2: i32) -> (i32, i32) {
    %c0_i32 = arith.constant 0 : i32
    return %arg0, %arg2 : i32, i32
  }
  func.func @transform_1(%arg0: i32, %arg1: i32, %arg2: i32) -> (i32, i32) {
    %c0_i32 = arith.constant 0 : i32
    return %arg1, %arg2 : i32, i32
  }
  func.func @transform_2(%arg0: i32, %arg1: i32, %arg2: i32) -> (i32, i32) {
    %c0_i32 = arith.constant 0 : i32
    return %arg0, %arg1 : i32, i32
  }
}

</mosaic_0001>

<bundles_post_ra>
// kernel: tpu_custom_call.1
= control target key start
LH: loop header
LB: loop body
LE: loop exit
PB: predicated region body
PF: predicated region fallthrough
CT: control target
= control target key end

     0   :  { %7 = vsyncpa [#allocation4], 0  ;;  %s217_s0 = inlined_call_operand.hbm [shape: f32[8,32], index: 0, kind: input, shape index: {}]   ;;  %s218_s1 = inlined_call_operand.hbm [shape: f32[8,32], index: 1, kind: input, shape index: {}]   ;;  %s219_s2 = inlined_call_operand.hbm [shape: f32[8,8], index: 2, kind: output, shape index: {}]  }
   0x1   :  { %8 = vsyncpa [#allocation7], 0 }
   0x2   :  { %9 = vsyncpa [#allocation5], 0  ;;  %s15_s11 = sshll.u32 %s217_s0, 4  ;;  %s186_s12 = smov [#allocation3]   ;;  %s16_s11 = int_to_ptr.hbm [resolvable:$true] %s15_s11 }
   0x3   :  { %s17_s13 = sshll.u32 %s186_s12, 4  ;;  %s26_s16 = sshll.u32 %s218_s1, 4  ;;  %s18_s13 = int_to_ptr.vmem [resolvable:$true] %s17_s13  ;;  %s27_s16 = int_to_ptr.hbm [resolvable:$true] %s26_s16 }
   0x4   :  { %20 = dma.hbm_to_vmem [thread:$0]  %s16_s11, 128, %s18_s13, [#allocation4]  }
   0x5   :  { %s187_s17 = smov [#allocation6]  }
   0x6   :  { %s28_s18 = sshll.u32 %s187_s17, 4  ;;  %s29_s18 = int_to_ptr.vmem [resolvable:$true] %s28_s18 }
   0x7   :  { %31 = dma.hbm_to_vmem [thread:$0]  %s27_s16, 128, %s29_s18, [#allocation7]  }
   0x8   :  { %180 = dma.done.wait [#allocation4], 128  }
   0x9   :  { %181 = vsyncadd [#allocation4], 4294967168 }
   0xa   :  { %182 = dma.done.wait [#allocation7], 128  }
   0xb   :  { %183 = vsyncadd [#allocation7], 4294967168  ;;  %vm44_vm0 = vcmask 64512   ;;  %v188_v0 = vmov 0.0   ;;  %vm49_vm1 = vcmask 261120   ;;  %v48_v1 = vld [vmem:[#allocation6] sm:$0xff] }
   0xc   :  { %45 = vst.msk [vmem:[#allocation2] sm:$0xff] %vm44_vm0, %v188_v0  ;;  %102 = vmatpush.xpose.msk.msra.mxu0 %vm49_vm1, %v48_v1  ;;  %v47_v2 = vld [vmem:[#allocation3] sm:$0xff]  ;;  %s189_s0 = smov [#allocation8]   ;;  %s91_s21 = sshll.u32 %s219_s2, 4  ;;  %s92_s21 = int_to_ptr.hbm [resolvable:$true] %s91_s21 }
   0xd   :  { %s89_s1 = sshll.u32 %s189_s0, 4  ;;  %s90_s1 = int_to_ptr.vmem [resolvable:$true] %s89_s1 }
   0xf   :  { %103 = vmatmul.msk.f32.vlgmr.msra.gmra.mxu0 %vm49_vm1, %v47_v2 }
  0x13   :  { %v46_v3 = vld [vmem:[#allocation2] sm:$0xff] }
  0x8c   :  { %v73_v4 = vpop.f32.mrf.mxu0 }
  0x8d   :  { %v76_v5 = vadd.f32 %v73_v4, %v46_v3 }
  0x8f   :  { %78 = vst.msk [vmem:[#allocation2] sm:$0xff] %vm44_vm0, %v76_v5 }
  0x96   :  { %v82_v6 = vld [vmem:[#allocation2] sm:$0xff] }
  0x97   :  { %83 = vst.msk [vmem:[#allocation8] sm:$0xff] %vm44_vm0, %v82_v6 }
  0x98   :  { %94 = dma.vmem_to_hbm [thread:$0]  %s90_s1, 128, %s92_s21, [#allocation5]  }
  0x99   :  { %184 = dma.done.wait [#allocation5], 128  }
  0x9a   :  { %185 = vsyncadd [#allocation5], 4294967168 }
  0x9b   :  { %99 = vsyncpa [#allocation4], 1 }
  0x9c   :  { %100 = vsyncpa [#allocation7], 1 }
  0x9d   :  { %101 = vsyncpa [#allocation5], 1 }

</bundles_post_ra>
